<compile_context>
chip_gen: v7x
topology: tpu7x:2x2x1
jax: 0.10.0
libtpu: 0.0.40
codegen_flags: <defaults>
</compile_context>

<pallas_src>
import jax
import jax.numpy as jnp
from jax.experimental import pallas as pl
from jax.experimental.pallas import tpu as pltpu


def _projection_kernel(x_ref, o_ref):
    # One [TB, D] tile resident in VMEM.  Rows are fully independent, so any
    # padded rows in a ragged final tile only produce out-of-bounds output
    # rows, which Pallas clips on writeback.
    x = x_ref[...].astype(jnp.float32)                # [TB, D]
    ss = jnp.sum(x * x, axis=-1, keepdims=True)       # [TB, 1]
    # s = (ss - 1)/(ss + 1)  and  1 - s = 2/(ss + 1): one reciprocal feeds both.
    inv = pl.reciprocal(ss + 1.0, approx=False)       # [TB, 1]
    scale = 2.0 * inv                                 # == 1 - s
    D = x.shape[-1]
    o_ref[:, :D] = (x * scale).astype(o_ref.dtype)    # first D coords
    o_ref[:, D:] = (1.0 - scale).astype(o_ref.dtype)  # appended coord == s


def _pick_block_rows(B, D, itemsize):
    """Largest row tile (multiple of 8) s.t. one in+out tile pair is ~2 MiB."""
    target_bytes = 2 * 1024 * 1024
    # Lane padding: D and D+1 each round up to a multiple of 128 in VMEM.
    d_pad = pl.cdiv(D, 128) * 128
    o_pad = pl.cdiv(D + 1, 128) * 128
    rows = target_bytes // ((d_pad + o_pad) * itemsize)
    rows = max(8, (int(rows) // 8) * 8)
    rows = min(rows, 4096)
    return B if B <= rows else rows


def projection(x, *, block_rows=None):
    """x: [B, D] float32 -> [B, D+1] float32 (Pallas TPU kernel)."""
    B, D = x.shape
    itemsize = jnp.dtype(x.dtype).itemsize

    if block_rows is None:
        tb = _pick_block_rows(B, D, itemsize)
    else:
        tb = B if B <= block_rows else block_rows
    grid = (pl.cdiv(B, tb),)

    # Scoped-VMEM budget: double-buffered input + output tiles (lane-padded),
    # clamped to stay well under v7x's 64 MiB physical VMEM.
    d_pad = pl.cdiv(D, 128) * 128
    o_pad = pl.cdiv(D + 1, 128) * 128
    tile_bytes = tb * (d_pad + o_pad) * itemsize       # one in-tile + one out-tile
    vmem_limit = int(min(max(2 * tile_bytes + (4 << 20), 16 << 20), 48 << 20))

    return pl.pallas_call(
        _projection_kernel,
        out_shape=jax.ShapeDtypeStruct((B, D + 1), x.dtype),
        grid=grid,
        in_specs=[pl.BlockSpec((tb, D), lambda i: (i, 0))],
        out_specs=pl.BlockSpec((tb, D + 1), lambda i: (i, 0)),
        compiler_params=pltpu.CompilerParams(
            dimension_semantics=("parallel",),   # rows independent -> megacore
            vmem_limit_bytes=vmem_limit,
        ),
    )(x)


def _projection_ref(x):
    # Pure-JAX reference mirroring the PyTorch loop.
    ss = jnp.sum(x * x, axis=-1, keepdims=True)
    s = -(1.0 - ss) / (1.0 + ss)
    return jnp.concatenate([x * (1.0 - s), s], axis=-1)


if __name__ == "__main__":
    key = jax.random.PRNGKey(0)

    # Default path (single tile: B fits in one block).
    B, D = 8, 32
    x = jax.random.normal(key, (B, D), dtype=jnp.float32)
    out = jax.block_until_ready(projection(x))
    ref = _projection_ref(x)
    assert out.shape == (B, D + 1), out.shape
    assert jnp.allclose(out, ref, atol=1e-5, rtol=1e-5), "mismatch vs reference"

    # Tiled path at small scale: multiple grid steps + a ragged final tile.
    B2 = 20
    x2 = jax.random.normal(jax.random.PRNGKey(1), (B2, D), dtype=jnp.float32)
    out2 = jax.block_until_ready(projection(x2, block_rows=8))
    ref2 = _projection_ref(x2)
    assert out2.shape == (B2, D + 1), out2.shape
    assert jnp.allclose(out2, ref2, atol=1e-5, rtol=1e-5), "tiled mismatch vs reference"

    print("KERNEL_OK")
</pallas_src>

<mosaic_0001>
module attributes {stable_mosaic.version = 11 : i64} {
  func.func @_projection_kernel(%arg0: i32, %arg1: memref<8x32xf32, #tpu.memory_space<vmem>>, %arg2: memref<8x33xf32, #tpu.memory_space<vmem>>) attributes {dimension_semantics = [#tpu.dimension_semantics<parallel>], iteration_bounds = array<i64: 1>, scalar_prefetch = 0 : i64, scratch_operands = 0 : i64, tpu.core_type = #tpu.core_type<tc>, window_params = [{transform_indices = @transform_0, window_bounds = array<i64: 8, 32>}, {transform_indices = @transform_1, window_bounds = array<i64: 8, 33>}]} {
    %c0 = arith.constant 0 : index
    %c0_0 = arith.constant 0 : index
    %0 = vector.load %arg1[%c0, %c0_0] : memref<8x32xf32, #tpu.memory_space<vmem>>, vector<8x32xf32>
    %1 = arith.mulf %0, %0 : vector<8x32xf32>
    %cst = arith.constant dense<0.000000e+00> : vector<8xf32>
    %2 = vector.multi_reduction <add>, %1, %cst [1] : vector<8x32xf32> to vector<8xf32>
    %3 = vector.shape_cast %2 : vector<8xf32> to vector<8x1xf32>
    %cst_1 = arith.constant 1.000000e+00 : f32
    %4 = vector.broadcast %cst_1 : f32 to vector<8x1xf32>
    %5 = arith.addf %3, %4 : vector<8x1xf32>
    %6 = tpu.reciprocal %5 : vector<8x1xf32> -> vector<8x1xf32>
    %cst_2 = arith.constant 2.000000e+00 : f32
    %7 = vector.broadcast %cst_2 : f32 to vector<8x1xf32>
    %8 = arith.mulf %7, %6 : vector<8x1xf32>
    %9 = vector.broadcast %8 : vector<8x1xf32> to vector<8x32xf32>
    %10 = arith.mulf %0, %9 : vector<8x32xf32>
    %c0_3 = arith.constant 0 : index
    %c0_4 = arith.constant 0 : index
    %11 = vector.load %arg2[%c0_3, %c0_4] : memref<8x33xf32, #tpu.memory_space<vmem>>, vector<8x32xf32>
    tpu.vector_store %arg2[%c0_3, %c0_4], %10 {strides = array<i32>} : memref<8x33xf32, #tpu.memory_space<vmem>>, vector<8x32xf32>,
    %cst_5 = arith.constant 1.000000e+00 : f32
    %12 = vector.broadcast %cst_5 : f32 to vector<8x1xf32>
    %13 = arith.subf %12, %8 : vector<8x1xf32>
    %c0_6 = arith.constant 0 : index
    %c32 = arith.constant 32 : index
    %14 = vector.load %arg2[%c0_6, %c32] : memref<8x33xf32, #tpu.memory_space<vmem>>, vector<8x1xf32>
    tpu.vector_store %arg2[%c0_6, %c32], %13 {strides = array<i32>} : memref<8x33xf32, #tpu.memory_space<vmem>>, vector<8x1xf32>,
    return
  }
  func.func @transform_0(%arg0: i32) -> (i32, i32) {
    %c0_i32 = arith.constant 0 : i32
    %c0_i32_0 = arith.constant 0 : i32
    return %arg0, %c0_i32 : i32, i32
  }
  func.func @transform_1(%arg0: i32) -> (i32, i32) {
    %c0_i32 = arith.constant 0 : i32
    %c0_i32_0 = arith.constant 0 : i32
    return %arg0, %c0_i32 : i32, i32
  }
}

</mosaic_0001>

<bundles_post_ra>
// kernel: tpu_custom_call.1
= control target key start
LH: loop header
LB: loop body
LE: loop exit
PB: predicated region body
PF: predicated region fallthrough
CT: control target
= control target key end

     0   :  { %6 = vsyncpa [#allocation3], 0  ;;  %s138_s0 = inlined_call_operand.hbm [shape: f32[8,32], index: 0, kind: input, shape index: {}]   ;;  %s139_s1 = inlined_call_operand.hbm [shape: f32[8,33], index: 1, kind: output, shape index: {}]  }
   0x1   :  { %7 = vsyncpa [#allocation4], 0  ;;  %s102_s6 = smov [#allocation2]   ;;  %s54_s10 = scalar_lea.hbm %s138_s0, 128 }
   0x2   :  { %s14_s7 = sshll.u32 %s102_s6, 4  ;;  %p55_p0 = scmp.ne.s32.totalorder %s138_s0, %s54_s10  ;;  %s15_s7 = int_to_ptr.vmem [resolvable:$true] %s14_s7 }
   0x3   :  { %p58_p1 = scmp.lt.u32.totalorder %s54_s10, %s138_s0 }
   0x5   :  { %p60_p2 = pnand %p58_p1, %p55_p0 }
   0x7   :  { %63 = shalt.err (!%p60_p2)
}
   0x8   :  { %s64_s15 = scalar_lea.vmem %s15_s7, 128  ;;  %p69_p4 = scmp.lt.s32.totalorder %s15_s7, %s15_s7 }
   0x9   :  { %p65_p3 = scmp.ne.s32.totalorder %s15_s7, %s64_s15  ;;  %p70_p5 = scmp.lt.s32.totalorder %s64_s15, %s64_s15 }
   0xb   :  { %p71_p6 = por %p70_p5, %p69_p4 }
   0xd   :  { %p72_p7 = pnand %p71_p6, %p65_p3 }
   0xf   :  { %75 = shalt.err (!%p72_p7)
}
  0x10   :  { %17 = dma.hbm_to_vmem [thread:$0]  %s138_s0, 128, %s15_s7, [#allocation3]  }
  0x11   :  { %98 = dma.done.wait [#allocation3], 128  }
  0x12   :  { %99 = vsyncadd [#allocation3], 4294967168  ;;  %v21_v0 = vld [vmem:[#allocation2] sm:$0xff]  ;;  %vm23_vm0 = vcmask 261120   ;;  %s103_s18 = smov [#allocation5]   ;;  %vm33_vm1 = vcmask 269568  }
  0x13   :  { %v22_v1 = vmul.f32 %v21_v0, %v21_v0  ;;  %s41_s19 = sshll.u32 %s103_s18, 4  ;;  %s42_s19 = int_to_ptr.vmem [resolvable:$true] %s41_s19 }
  0x14   :  { %s76_s0 = scalar_lea.vmem %s42_s19, 128  ;;  %p81_p9 = scmp.lt.s32.totalorder %s42_s19, %s42_s19 }
  0x15   :  { %v24_v2 = vsel %vm23_vm0, %v22_v1, 0.0  ;;  %p77_p8 = scmp.ne.s32.totalorder %s42_s19, %s76_s0  ;;  %p82_p10 = scmp.lt.s32.totalorder %s76_s0, %s76_s0 }
  0x16   :  { %25 = vadd.xlane.f32.xlu0 %v24_v2 }
  0x17   :  { %p83_p11 = por %p82_p10, %p81_p9 }
  0x19   :  { %p84_p12 = pnand %p83_p11, %p77_p8 }
  0xa3   :  { %v26_v3 = vpop.xlane.xlu0 %25 }
  0xa4   :  { %v27_v4 = vadd.f32 1.0, %v26_v3 }
  0xa6   :  { %52 = vrcp.f32 %v27_v4 }
  0xb0   :  { %v53_v5 = vpop.eup %52 }
  0xb1   :  { %v29_v6 = vmul.f32 2.0, %v53_v5 }
  0xb3   :  { %v30_v7 = vmul.f32 %v29_v6, %v21_v0  ;;  %v32_v8 = vsub.f32 1.0, %v29_v6 }
  0xb5   :  { %31 = vst.msk [vmem:[#allocation5] sm:$0xff] %vm23_vm0, %v30_v7 }
  0xb6   :  { %34 = vst.msk [vmem:[#allocation5] sm:$0xff] %vm33_vm1, %v32_v8 }
  0xb7   :  { %87 = shalt.err (!%p84_p12)
}
  0xb8   :  { %s88_s22 = scalar_lea.hbm %s139_s1, 128 }
  0xb9   :  { %p89_p13 = scmp.ne.s32.totalorder %s139_s1, %s88_s22  ;;  %p92_p0 = scmp.lt.u32.totalorder %s88_s22, %s139_s1 }
  0xbb   :  { %p94_p1 = pnand %p92_p0, %p89_p13 }
  0xbd   :  { %97 = shalt.err (!%p94_p1)
}
  0xbe   :  { %44 = dma.vmem_to_hbm [thread:$0]  %s42_s19, 128, %s139_s1, [#allocation4]  }
  0xbf   :  { %100 = dma.done.wait [#allocation4], 128  }
  0xc0   :  { %101 = vsyncadd [#allocation4], 4294967168 }
  0xc1   :  { %48 = vsyncpa [#allocation3], 1 }
  0xc2   :  { %49 = vsyncpa [#allocation4], 1 }

</bundles_post_ra>
